<compile_context>
chip_gen: v7x
topology: tpu7x:2x2x1
jax: 0.10.0
libtpu: 0.0.40
codegen_flags: <defaults>
</compile_context>

<pallas_src>
import functools
import math

import jax
import jax.numpy as jnp
from jax.experimental import pallas as pl
from jax.experimental.pallas import tpu as pltpu


# ~1.5 MiB per double-buffered I/O tile: measured HBM roofline saturates at
# 512-1024-lane tiles; larger tiles only add VMEM/vreg pressure (esp. v7x).
_PER_TILE_TARGET = 1536 * 1024


@functools.lru_cache(maxsize=None)
def _vmem_budgets():
    """Return (tile VMEM budget, vmem_limit_bytes) for this chip generation."""
    cap = None
    try:
        cap = getattr(pltpu.get_tpu_info(), "vmem_capacity_bytes", None)
    except Exception:
        cap = None
    if not cap:
        cap = 64 * 1024 * 1024          # conservative fallback (v7x per-TC VMEM)
    return int(cap * 0.25), int(cap * 0.60)


@functools.lru_cache(maxsize=None)
def _has_bf16_vpu():
    """bf16 VALU exists on v6e/v7x; v5e (and older) must upcast to f32."""
    try:
        kind = jax.devices()[0].device_kind.lower()
    except Exception:
        return False
    return ("v6" in kind) or ("v7" in kind)


# ---------------------------------------------------------------------------
# Kernels
# ---------------------------------------------------------------------------

def _ln_rows_kernel(x_ref, w_ref, b_ref, o_ref, *, eps, lp_epilogue):
    """channels_last: (TM, C) tile, normalize over the last (lane) axis."""
    x = x_ref[...].astype(jnp.float32)
    inv_c = 1.0 / x.shape[-1]
    # Fused single-pass statistics: sum(x) and sum(x*x) have no serial
    # dependency and no centered f32 temporary is materialized for the
    # reduction.  Biased variance, clamped at 0 (E[x^2]-mean^2 form).
    mean = jnp.sum(x, axis=-1, keepdims=True) * inv_c
    mean_sq = jnp.sum(x * x, axis=-1, keepdims=True) * inv_c
    var = jnp.maximum(mean_sq - mean * mean, 0.0)
    inv = jax.lax.rsqrt(var + eps)                       # EUP (free slot)
    if lp_epilogue:
        # v6e/v7x: affine epilogue on bf16 vregs (2x packing); stats stay f32.
        dt = o_ref.dtype
        xn = (x_ref[...] - mean.astype(dt)) * inv.astype(dt)
        o_ref[...] = xn * w_ref[...] + b_ref[...]        # params pre-cast to dt
    else:
        # params pre-cast to f32 host-side
        o_ref[...] = ((x - mean) * inv * w_ref[...] + b_ref[...]).astype(o_ref.dtype)


def _ln_channels_kernel(x_ref, w_ref, b_ref, o_ref, *, eps, lp_epilogue):
    """channels_first: (BN, C, TL) tile, normalize over the channel (sublane) axis."""
    x = x_ref[...].astype(jnp.float32)
    inv_c = 1.0 / x.shape[1]
    mean = jnp.sum(x, axis=1, keepdims=True) * inv_c     # (BN, 1, TL)
    mean_sq = jnp.sum(x * x, axis=1, keepdims=True) * inv_c
    var = jnp.maximum(mean_sq - mean * mean, 0.0)        # biased variance
    inv = jax.lax.rsqrt(var + eps)
    w = w_ref[...][None]                                 # (1, C, 1)
    b = b_ref[...][None]
    if lp_epilogue:
        dt = o_ref.dtype
        xn = (x_ref[...] - mean.astype(dt)) * inv.astype(dt)
        o_ref[...] = xn * w + b
    else:
        o_ref[...] = ((x - mean) * inv * w + b).astype(o_ref.dtype)


# ---------------------------------------------------------------------------
# Tile-size selection (VMEM-budgeted, sublane/lane aligned, >= ~8 grid steps)
# ---------------------------------------------------------------------------

def _choose_tile_rows(rows, C, itemsize, budget):
    """Row tile for the (rows, C) channels_last layout."""
    sublane = 16 if itemsize == 2 else 8
    if rows <= sublane:
        return rows                                      # full-dim block is legal
    per_row = C * (4 * itemsize + 16)                    # dbl-buffered io + f32 temps
    tm = min(budget // max(per_row, 1),
             _PER_TILE_TARGET // max(C * itemsize, 1),
             rows)
    # keep >= ~8 grid steps: both v7x TensorCores busy + deep pipeline
    tm = min(tm, max(sublane, pl.cdiv(rows, 8)))
    tm = max(sublane, (tm // sublane) * sublane)
    return min(tm, rows)


def _choose_cf_block(N, C, L, itemsize, budget):
    """(bn, tl) block for the (N, C, L) channels_first layout."""
    per_col = C * (4 * itemsize + 16)
    max_cols = max(1, min(budget // max(per_col, 1),
                          _PER_TILE_TARGET // max(C * itemsize, 1)))
    lane_cap = min(2048, max_cols)
    if L <= lane_cap:
        # Small / medium spatial extent (ConvNeXt 7x7 / 14x14 stages): keep the
        # whole spatial axis on lanes and batch several N per grid step to
        # amortize per-step overhead and strided-DMA descriptor cost.
        bn = max(1, lane_cap // L)
        if N >= 8:
            bn = min(bn, N // 8)                         # >= 8 steps when N allows
        return max(1, min(bn, N)), L
    # Large spatial extent: one batch element per step, lane-dense tile.
    tl = lane_cap
    min_lane_steps = pl.cdiv(8, max(N, 1))               # total steps >= ~8
    if min_lane_steps > 1:
        tl = min(tl, max(128, pl.cdiv(L, min_lane_steps)))
    tl = max(128, (tl // 128) * 128)                     # unmasked lane-dense stores
    return 1, min(tl, L)


# ---------------------------------------------------------------------------
# pallas_call wrappers
# ---------------------------------------------------------------------------

def _layernorm_channels_last(x2d, weight, bias, eps):
    rows, C = x2d.shape
    itemsize = x2d.dtype.itemsize
    budget, vmem_limit = _vmem_budgets()
    tm = _choose_tile_rows(rows, C, itemsize, budget)
    lp = _has_bf16_vpu() and x2d.dtype == jnp.bfloat16
    pdt = x2d.dtype if lp else jnp.float32
    w2 = weight.astype(pdt).reshape(1, C)
    b2 = bias.astype(pdt).reshape(1, C)
    grid = (pl.cdiv(rows, tm),)

    # NOTE: if C is not a multiple of 128 (e.g. ConvNeXt C=96), output stores
    # are masked (vst.msk) and ~25% of each lane row is dead work; recovering
    # that requires padding C upstream at the model level -- we intentionally
    # do NOT add per-call HBM pad copies here.
    return pl.pallas_call(
        functools.partial(_ln_rows_kernel, eps=eps, lp_epilogue=lp),
        out_shape=jax.ShapeDtypeStruct((rows, C), x2d.dtype),
        grid_spec=pltpu.PrefetchScalarGridSpec(
            num_scalar_prefetch=0,
            grid=grid,
            in_specs=[
                pl.BlockSpec((tm, C), lambda i: (i, 0)),
                pl.BlockSpec((1, C), lambda i: (0, 0)),
                pl.BlockSpec((1, C), lambda i: (0, 0)),
            ],
            out_specs=pl.BlockSpec((tm, C), lambda i: (i, 0)),
        ),
        compiler_params=pltpu.CompilerParams(
            dimension_semantics=("parallel",),
            vmem_limit_bytes=vmem_limit),
        cost_estimate=pl.CostEstimate(
            flops=8 * rows * C,
            transcendentals=rows,
            bytes_accessed=2 * rows * C * itemsize + 2 * C * w2.dtype.itemsize),
    )(x2d, w2, b2)


def _layernorm_channels_first(x, weight, bias, eps):
    # x: (N, C, *spatial).  Flatten spatial dims (free, contiguous reshape);
    # no NCHW<->NHWC transpose round-trips through HBM.
    N, C = x.shape[0], x.shape[1]
    L = math.prod(x.shape[2:]) if x.ndim > 2 else 1
    if L == 1:
        # Degenerate spatial extent: lane width 1 wastes 127/128 of every vreg
        # and DMA; normalizing over C per position is exactly the rows kernel.
        y = _layernorm_channels_last(x.reshape(N, C), weight, bias, eps)
        return y.reshape(x.shape)

    x3 = x.reshape(N, C, L)
    itemsize = x.dtype.itemsize
    budget, vmem_limit = _vmem_budgets()
    bn, tl = _choose_cf_block(N, C, L, itemsize, budget)
    lp = _has_bf16_vpu() and x.dtype == jnp.bfloat16
    pdt = x.dtype if lp else jnp.float32
    w2 = weight.astype(pdt).reshape(C, 1)
    b2 = bias.astype(pdt).reshape(C, 1)
    grid = (pl.cdiv(N, bn), pl.cdiv(L, tl))

    y3 = pl.pallas_call(
        functools.partial(_ln_channels_kernel, eps=eps, lp_epilogue=lp),
        out_shape=jax.ShapeDtypeStruct((N, C, L), x.dtype),
        grid_spec=pltpu.PrefetchScalarGridSpec(
            num_scalar_prefetch=0,
            grid=grid,
            in_specs=[
                pl.BlockSpec((bn, C, tl), lambda n, l: (n, 0, l)),
                pl.BlockSpec((C, 1), lambda n, l: (0, 0)),
                pl.BlockSpec((C, 1), lambda n, l: (0, 0)),
            ],
            out_specs=pl.BlockSpec((bn, C, tl), lambda n, l: (n, 0, l)),
        ),
        compiler_params=pltpu.CompilerParams(
            dimension_semantics=("parallel", "parallel"),
            vmem_limit_bytes=vmem_limit),
        cost_estimate=pl.CostEstimate(
            flops=8 * N * C * L,
            transcendentals=N * L,
            bytes_accessed=2 * N * C * L * itemsize + 2 * C * w2.dtype.itemsize),
    )(x3, w2, b2)
    return y3.reshape(x.shape)


def layer_norm(x, weight, bias, eps=1e-6, data_format="channels_last"):
    """Forward pass equivalent of the PyTorch ConvNeXt LayerNorm module."""
    if data_format not in ("channels_last", "channels_first"):
        raise NotImplementedError

    if data_format == "channels_last":
        C = x.shape[-1]
        rows = math.prod(x.shape[:-1]) if x.ndim > 1 else 1
        y = _layernorm_channels_last(x.reshape(rows, C), weight, bias, eps)
        return y.reshape(x.shape)
    else:
        return _layernorm_channels_first(x, weight, bias, eps)


# ---------------------------------------------------------------------------
# Plain-JAX reference (matches the PyTorch semantics) + self-test
# ---------------------------------------------------------------------------

def _reference(x, weight, bias, eps, data_format):
    if data_format == "channels_last":
        u = jnp.mean(x, axis=-1, keepdims=True)
        s = jnp.mean((x - u) ** 2, axis=-1, keepdims=True)
        xn = (x - u) / jnp.sqrt(s + eps)
        return weight * xn + bias
    else:
        u = jnp.mean(x, axis=1, keepdims=True)
        s = jnp.mean((x - u) ** 2, axis=1, keepdims=True)
        xn = (x - u) / jnp.sqrt(s + eps)
        shape = (x.shape[1],) + (1,) * (x.ndim - 2)
        return weight.reshape(shape) * xn + bias.reshape(shape)


if __name__ == "__main__":
    key = jax.random.PRNGKey(0)
    eps = 1e-6

    def check(name, x, w, b, data_format, tol):
        y = jax.block_until_ready(layer_norm(x, w, b, eps, data_format))
        ref = _reference(x.astype(jnp.float32), w.astype(jnp.float32),
                         b.astype(jnp.float32), eps, data_format)
        err = float(jnp.max(jnp.abs(y.astype(jnp.float32) - ref)))
        assert err < tol, f"{name} mismatch: max abs err {err}"

    k = jax.random.split(key, 8)

    # channels_first NCHW, f32 (goes through the batched (bn, C, L) path).
    C = 4
    w = 1.0 + 0.1 * jax.random.normal(k[0], (C,), jnp.float32)
    b = 0.05 * jax.random.normal(k[1], (C,), jnp.float32)
    x_cf = jax.random.normal(k[2], (2, C, 16, 16), jnp.float32)
    check("channels_first f32", x_cf, w, b, "channels_first", 2e-4)

    # channels_last (..., C), f32.
    x_cl = jax.random.normal(k[3], (2, 16, 16, C), jnp.float32)
    check("channels_last f32", x_cl, w, b, "channels_last", 2e-4)

    # ConvNeXt-like C=96 bf16 at 7x7 spatial: exercises the small-L batched
    # channels_first path, the bf16 epilogue (v6e/v7x), and the masked-store
    # channels_last path (C=96 not a multiple of 128).
    C96 = 96
    w96 = (1.0 + 0.1 * jax.random.normal(k[4], (C96,), jnp.float32)).astype(jnp.bfloat16)
    b96 = (0.05 * jax.random.normal(k[5], (C96,), jnp.float32)).astype(jnp.bfloat16)
    x96_cf = jax.random.normal(k[6], (2, C96, 7, 7), jnp.float32).astype(jnp.bfloat16)
    check("channels_first bf16 C=96", x96_cf, w96, b96, "channels_first", 6e-2)
    x96_cl = jax.random.normal(k[7], (2, 7, 7, C96), jnp.float32).astype(jnp.bfloat16)
    check("channels_last bf16 C=96", x96_cl, w96, b96, "channels_last", 6e-2)

    print("KERNEL_OK")
</pallas_src>

<mosaic_0001>
module attributes {stable_mosaic.version = 11 : i64} {
  func.func @_ln_channels_kernel(%arg0: i32, %arg1: i32, %arg2: memref<2x4x256xf32, #tpu.memory_space<vmem>>, %arg3: memref<4x1xf32, #tpu.memory_space<vmem>>, %arg4: memref<4x1xf32, #tpu.memory_space<vmem>>, %arg5: memref<2x4x256xf32, #tpu.memory_space<vmem>>) attributes {dimension_semantics = [#tpu.dimension_semantics<parallel>, #tpu.dimension_semantics<parallel>], iteration_bounds = array<i64: 1, 1>, scalar_prefetch = 0 : i64, scratch_operands = 0 : i64, tpu.core_type = #tpu.core_type<tc>, window_params = [{transform_indices = @transform_0, window_bounds = array<i64: 2, 4, 256>}, {pipeline_mode = #tpu.pipeline_mode<synchronous>, transform_indices = @transform_1, window_bounds = array<i64: 4, 1>}, {pipeline_mode = #tpu.pipeline_mode<synchronous>, transform_indices = @transform_2, window_bounds = array<i64: 4, 1>}, {transform_indices = @transform_3, window_bounds = array<i64: 2, 4, 256>}]} {
    %c0 = arith.constant 0 : index
    %c0_0 = arith.constant 0 : index
    %c0_1 = arith.constant 0 : index
    %0 = vector.load %arg2[%c0, %c0_0, %c0_1] : memref<2x4x256xf32, #tpu.memory_space<vmem>>, vector<2x4x256xf32>
    %cst = arith.constant dense<0.000000e+00> : vector<2x256xf32>
    %1 = vector.multi_reduction <add>, %0, %cst [1] : vector<2x4x256xf32> to vector<2x256xf32>
    %2 = vector.shape_cast %1 : vector<2x256xf32> to vector<2x1x256xf32>
    %cst_2 = arith.constant 2.500000e-01 : f32
    %3 = vector.broadcast %cst_2 : f32 to vector<2x1x256xf32>
    %4 = arith.mulf %2, %3 : vector<2x1x256xf32>
    %5 = arith.mulf %0, %0 : vector<2x4x256xf32>
    %cst_3 = arith.constant dense<0.000000e+00> : vector<2x256xf32>
    %6 = vector.multi_reduction <add>, %5, %cst_3 [1] : vector<2x4x256xf32> to vector<2x256xf32>
    %7 = vector.shape_cast %6 : vector<2x256xf32> to vector<2x1x256xf32>
    %cst_4 = arith.constant 2.500000e-01 : f32
    %8 = vector.broadcast %cst_4 : f32 to vector<2x1x256xf32>
    %9 = arith.mulf %7, %8 : vector<2x1x256xf32>
    %10 = arith.mulf %4, %4 : vector<2x1x256xf32>
    %11 = arith.subf %9, %10 : vector<2x1x256xf32>
    %cst_5 = arith.constant 0.000000e+00 : f32
    %12 = vector.broadcast %cst_5 : f32 to vector<2x1x256xf32>
    %13 = arith.maximumf %11, %12 : vector<2x1x256xf32>
    %cst_6 = arith.constant 9.99999997E-7 : f32
    %14 = vector.broadcast %cst_6 : f32 to vector<2x1x256xf32>
    %15 = arith.addf %13, %14 : vector<2x1x256xf32>
    %16 = math.rsqrt %15 : vector<2x1x256xf32>
    %c0_7 = arith.constant 0 : index
    %c0_8 = arith.constant 0 : index
    %17 = vector.load %arg3[%c0_7, %c0_8] : memref<4x1xf32, #tpu.memory_space<vmem>>, vector<4x1xf32>
    %18 = vector.shape_cast %17 : vector<4x1xf32> to vector<1x4x1xf32>
    %c0_9 = arith.constant 0 : index
    %c0_10 = arith.constant 0 : index
    %19 = vector.load %arg4[%c0_9, %c0_10] : memref<4x1xf32, #tpu.memory_space<vmem>>, vector<4x1xf32>
    %20 = vector.shape_cast %19 : vector<4x1xf32> to vector<1x4x1xf32>
    %21 = vector.broadcast %4 : vector<2x1x256xf32> to vector<2x4x256xf32>
    %22 = arith.subf %0, %21 : vector<2x4x256xf32>
    %23 = vector.broadcast %16 : vector<2x1x256xf32> to vector<2x4x256xf32>
    %24 = arith.mulf %22, %23 : vector<2x4x256xf32>
    %25 = vector.broadcast %18 : vector<1x4x1xf32> to vector<2x4x256xf32>
    %26 = arith.mulf %24, %25 : vector<2x4x256xf32>
    %27 = vector.broadcast %20 : vector<1x4x1xf32> to vector<2x4x256xf32>
    %28 = arith.addf %26, %27 : vector<2x4x256xf32>
    %c0_11 = arith.constant 0 : index
    %c0_12 = arith.constant 0 : index
    %c0_13 = arith.constant 0 : index
    %29 = vector.load %arg5[%c0_11, %c0_12, %c0_13] : memref<2x4x256xf32, #tpu.memory_space<vmem>>, vector<2x4x256xf32>
    tpu.vector_store %arg5[%c0_11, %c0_12, %c0_13], %28 {strides = array<i32>} : memref<2x4x256xf32, #tpu.memory_space<vmem>>, vector<2x4x256xf32>,
    return
  }
  func.func @transform_0(%arg0: i32, %arg1: i32) -> (i32, i32, i32) {
    %c0_i32 = arith.constant 0 : i32
    %c0_i32_0 = arith.constant 0 : i32
    return %arg0, %c0_i32, %arg1 : i32, i32, i32
  }
  func.func @transform_1(%arg0: i32, %arg1: i32) -> (i32, i32) {
    %c0_i32 = arith.constant 0 : i32
    %c0_i32_0 = arith.constant 0 : i32
    %c0_i32_1 = arith.constant 0 : i32
    return %c0_i32, %c0_i32_0 : i32, i32
  }
  func.func @transform_2(%arg0: i32, %arg1: i32) -> (i32, i32) {
    %c0_i32 = arith.constant 0 : i32
    %c0_i32_0 = arith.constant 0 : i32
    %c0_i32_1 = arith.constant 0 : i32
    return %c0_i32, %c0_i32_0 : i32, i32
  }
  func.func @transform_3(%arg0: i32, %arg1: i32) -> (i32, i32, i32) {
    %c0_i32 = arith.constant 0 : i32
    %c0_i32_0 = arith.constant 0 : i32
    return %arg0, %c0_i32, %arg1 : i32, i32, i32
  }
}

</mosaic_0001>

<bundles_post_ra>
// kernel: tpu_custom_call.1
= control target key start
LH: loop header
LB: loop body
LE: loop exit
PB: predicated region body
PF: predicated region fallthrough
CT: control target
= control target key end

     0   :  { %8 = vsyncpa [#allocation3], 0  ;;  %s350_s0 = inlined_call_operand.hbm [shape: f32[2,4,256], index: 0, kind: input, shape index: {}]   ;;  %s351_s1 = inlined_call_operand.vmem [shape: f32[4,1], index: 1, kind: input, shape index: {}]   ;;  %s352_s2 = inlined_call_operand.vmem [shape: f32[4,1], index: 2, kind: input, shape index: {}]   ;;  %s353_s3 = inlined_call_operand.hbm [shape: f32[2,4,256], index: 3, kind: output, shape index: {}]  }
   0x1   :  { %9 = vsyncpa [#allocation4], 0  ;;  %s264_s12 = smov [#allocation2]   ;;  %s216_s16 = scalar_lea.hbm %s350_s0, 256 }
   0x2   :  { %s15_s13 = sshll.u32 %s264_s12, 4  ;;  %p217_p0 = scmp.ne.s32.totalorder %s350_s0, %s216_s16  ;;  %s16_s13 = int_to_ptr.vmem [resolvable:$true] %s15_s13 }
   0x3   :  { %p220_p1 = scmp.lt.u32.totalorder %s216_s16, %s350_s0 }
   0x5   :  { %p222_p2 = pnand %p220_p1, %p217_p0 }
   0x7   :  { %225 = shalt.err (!%p222_p2)
}
   0x8   :  { %s226_s21 = scalar_lea.vmem %s16_s13, 256  ;;  %p231_p4 = scmp.lt.s32.totalorder %s16_s13, %s16_s13 }
   0x9   :  { %p227_p3 = scmp.ne.s32.totalorder %s16_s13, %s226_s21  ;;  %p232_p5 = scmp.lt.s32.totalorder %s226_s21, %s226_s21 }
   0xb   :  { %p233_p6 = por %p232_p5, %p231_p4 }
   0xd   :  { %p234_p7 = pnand %p233_p6, %p227_p3 }
   0xf   :  { %237 = shalt.err (!%p234_p7)
}
  0x10   :  { %s265_s22 = smov 128   ;;  %s266_s23 = smov 8  }
  0x11   :  { %21 = dma.hbm_to_vmem [thread:$0]  %s350_s0, 256, %s16_s13, [#allocation3], %s265_s22, %s265_s22, %s266_s23  }
  0x12   :  { %260 = dma.done.wait [#allocation3], 256  }
  0x13   :  { %261 = vsyncadd [#allocation3], 4294967040  ;;  %v267_v0 = vmov 0   ;;  %v130_v1 = vld [vmem:[%s351_s1] sm:$0xf]  ;;  %v313_v4 = vld [vmem:[#allocation2 + $0x8] sm:$0xff] }
  0x14   :  { %205 = vset.pattern.permute.xlu0 %v267_v0  ;;  %v131_v2 = vld [vmem:[%s352_s2] sm:$0xf]  ;;  %vm37_vm0 = vcmask 1043456   ;;  %v34_v7 = vcombine.high %v313_v4, %v313_v4  ;;  %v71_v8 = vmul.f32 %v313_v4, %v313_v4  ;;  %s269_s0 = smov [#allocation5]  }
  0x15   :  { %154 = vperm.xlu0 %205, %v130_v1   ;;  %v311_v3 = vld [vmem:[#allocation2] sm:$0xff]  ;;  %v52_v12 = vsel %vm37_vm0, %v313_v4, 0.0  ;;  %s187_s1 = sshll.u32 %s269_s0, 4  ;;  %s188_s1 = int_to_ptr.vmem [resolvable:$true] %s187_s1 }
  0x16   :  { %v33_v5 = vcombine.high %v311_v3, %v311_v3  ;;  %v70_v6 = vmul.f32 %v311_v3, %v311_v3  ;;  %v38_v9 = vsel %vm37_vm0, %v311_v3, 0.0  ;;  %v59_v14 = vsel %vm37_vm0, %v34_v7, 0.0  ;;  %s238_s2 = scalar_lea.vmem %s188_s1, 256  ;;  %p243_p9 = scmp.lt.s32.totalorder %s188_s1, %s188_s1 }
  0x17   :  { %v39_v13 = vrot.slane %v38_v9, 4  ;;  %v75_v15 = vcombine.high %v71_v8, %v71_v8  ;;  %v53_v18 = vrot.slane %v52_v12, 4  ;;  %v60_v20 = vrot.slane %v59_v14, 4  ;;  %p239_p8 = scmp.ne.s32.totalorder %s188_s1, %s238_s2  ;;  %p244_p10 = scmp.lt.s32.totalorder %s238_s2, %s238_s2 }
  0x18   :  { %v45_v10 = vsel %vm37_vm0, %v33_v5, 0.0  ;;  %v74_v11 = vcombine.high %v70_v6, %v70_v6  ;;  %v78_v17 = vsel %vm37_vm0, %v70_v6, 0.0  ;;  %v92_v21 = vsel %vm37_vm0, %v71_v8, 0.0 }
  0x19   :  { %168 = vperm.xlu0 %205, %v131_v2   ;;  %v46_v16 = vrot.slane %v45_v10, 4  ;;  %v40_v22 = vadd.f32 %v39_v13, %v38_v9  ;;  %v79_v23 = vrot.slane %v78_v17, 4  ;;  %v99_v24 = vsel %vm37_vm0, %v75_v15, 0.0  ;;  %p245_p11 = por %p244_p10, %p243_p9 }
  0x1a   :  { %v85_v19 = vsel %vm37_vm0, %v74_v11, 0.0  ;;  %v54_v27 = vadd.f32 %v53_v18, %v52_v12  ;;  %v93_v28 = vrot.slane %v92_v21, 4  ;;  %v61_v29 = vadd.f32 %v60_v20, %v59_v14 }
  0x1b   :  { %v47_v25 = vadd.f32 %v46_v16, %v45_v10  ;;  %v86_v26 = vrot.slane %v85_v19, 4  ;;  %v100_v30 = vrot.slane %v99_v24, 4  ;;  %v41_v31 = vrot.slane %v40_v22, 2  ;;  %p246_p12 = pnand %p245_p11, %p239_p8 }
  0x1c   :  { %v80_v32 = vadd.f32 %v79_v23, %v78_v17  ;;  %v55_v35 = vrot.slane %v54_v27, 2  ;;  %v94_v36 = vadd.f32 %v93_v28, %v92_v21  ;;  %v62_v37 = vrot.slane %v61_v29, 2 }
  0x1d   :  { %v48_v33 = vrot.slane %v47_v25, 2  ;;  %v87_v34 = vadd.f32 %v86_v26, %v85_v19  ;;  %v101_v38 = vadd.f32 %v100_v30, %v99_v24  ;;  %v42_v39 = vadd.f32 %v41_v31, %v40_v22 }
  0x1e   :  { %v81_v40 = vrot.slane %v80_v32, 2  ;;  %v56_v43 = vadd.f32 %v55_v35, %v54_v27  ;;  %v95_v44 = vrot.slane %v94_v36, 2  ;;  %v63_v45 = vadd.f32 %v62_v37, %v61_v29 }
  0x1f   :  { %v49_v41 = vadd.f32 %v48_v33, %v47_v25  ;;  %v88_v42 = vrot.slane %v87_v34, 2  ;;  %v102_v46 = vrot.slane %v101_v38, 2  ;;  %v43_v47 = vrot.slane %v42_v39, 1 }
  0x20   :  { %v82_v48 = vadd.f32 %v81_v40, %v80_v32  ;;  %v57_v51 = vrot.slane %v56_v43, 1  ;;  %v96_v52 = vadd.f32 %v95_v44, %v94_v36  ;;  %v64_v53 = vrot.slane %v63_v45, 1 }
  0x21   :  { %v50_v49 = vrot.slane %v49_v41, 1  ;;  %v89_v50 = vadd.f32 %v88_v42, %v87_v34  ;;  %v103_v54 = vadd.f32 %v102_v46, %v101_v38  ;;  %v44_v55 = vadd.f32 %v43_v47, %v42_v39 }
  0x22   :  { %v83_v56 = vrot.slane %v82_v48, 1  ;;  %v58_v59 = vadd.f32 %v57_v51, %v56_v43  ;;  %v97_v60 = vrot.slane %v96_v52, 1  ;;  %v65_v61 = vadd.f32 %v64_v53, %v63_v45 }
  0x23   :  { %v51_v57 = vadd.f32 %v50_v49, %v49_v41  ;;  %v90_v58 = vrot.slane %v89_v50, 1  ;;  %v104_v62 = vrot.slane %v103_v54, 1  ;;  %v66_v63 = vmul.f32 0.25, %v44_v55 }
  0x24   :  { %v84_v0 = vadd.f32 %v83_v56, %v82_v48  ;;  %v68_v5 = vmul.f32 0.25, %v58_v59  ;;  %v98_v6 = vadd.f32 %v97_v60, %v96_v52  ;;  %v69_v7 = vmul.f32 0.25, %v65_v61 }
  0x25   :  { %v67_v1 = vmul.f32 0.25, %v51_v57  ;;  %v91_v2 = vadd.f32 %v90_v58, %v89_v50  ;;  %v105_v8 = vadd.f32 %v104_v62, %v103_v54  ;;  %v110_v10 = vmul.f32 %v66_v63, %v66_v63 }
  0x26   :  { %v106_v9 = vmul.f32 0.25, %v84_v0  ;;  %v108_v13 = vmul.f32 0.25, %v98_v6  ;;  %v112_v14 = vmul.f32 %v68_v5, %v68_v5  ;;  %v113_v16 = vmul.f32 %v69_v7, %v69_v7 }
  0x27   :  { %v107_v11 = vmul.f32 0.25, %v91_v2  ;;  %v111_v12 = vmul.f32 %v67_v1, %v67_v1  ;;  %v109_v15 = vmul.f32 0.25, %v105_v8  ;;  %v268_v29 = vmov 839922192  }
  0x28   :  { %v114_v17 = vsub.f32 %v106_v9, %v110_v10  ;;  %v116_v19 = vsub.f32 %v108_v13, %v112_v14  ;;  %v157_v30 = vunpack.c.l.s4 %v268_v29  ;;  %v159_v31 = vlaneseq }
  0x29   :  { %v115_v18 = vsub.f32 %v107_v11, %v111_v12  ;;  %v117_v20 = vsub.f32 %v109_v15, %v113_v16  ;;  %v136_v37 = vcombine.low %v66_v63, %v67_v1  ;;  %v137_v38 = vcombine.low %v68_v5, %v69_v7 }
  0x2a   :  { %v118_v21 = vmax.f32 %v114_v17, 0.0  ;;  %v120_v23 = vmax.f32 %v116_v19, 0.0  ;;  %v158_v34 = vunpack.c.0.s8 %v157_v30  ;;  %v160_v35 = vshrl.u32 %v159_v31, 7 }
  0x2b   :  { %v119_v22 = vmax.f32 %v115_v18, 0.0  ;;  %v121_v24 = vmax.f32 %v117_v20, 0.0  ;;  %v140_v41 = vsub.f32 %v311_v3, %v136_v37  ;;  %v141_v42 = vsub.f32 %v313_v4, %v137_v38 }
  0x2c   :  { %v122_v25 = vadd.f32 1e-06, %v118_v21  ;;  %v124_v27 = vadd.f32 1e-06, %v120_v23  ;;  %v161_v40 = vsub.s32 %v158_v34, %v160_v35 }
  0x2d   :  { %v123_v26 = vadd.f32 1e-06, %v119_v22  ;;  %v125_v28 = vadd.f32 1e-06, %v121_v24 }
  0x2e   :  { %208 = vrsqrt.f32 %v122_v25 }
  0x2f   :  { %210 = vrsqrt.f32 %v123_v26 }
  0x30   :  { %212 = vrsqrt.f32 %v124_v27 }
  0x31   :  { %214 = vrsqrt.f32 %v125_v28 }
  0x38   :  { %v209_v32 = vpop.eup %208 }
  0x39   :  { %v211_v33 = vpop.eup %210 }
  0x3a   :  { %v213_v36 = vpop.eup %212  ;;  %v146_v43 = vcombine.low %v209_v32, %v211_v33 }
  0x3b   :  { %v215_v39 = vpop.eup %214 }
  0x3c   :  { %v147_v44 = vcombine.low %v213_v36, %v215_v39  ;;  %v150_v46 = vmul.f32 %v146_v43, %v140_v41 }
  0x3e   :  { %v151_v47 = vmul.f32 %v147_v44, %v141_v42 }
  0x94   :  { %v155_v45 = vpop.permute.xlu0 %154 }
  0x95   :  { %v162_v48 = vrot.slane %v155_v45, %v161_v40 }
  0x97   :  { %v164_v50 = vmul.f32 %v162_v48, %v150_v46  ;;  %v165_v51 = vmul.f32 %v162_v48, %v151_v47 }
  0x98   :  { %v169_v49 = vpop.permute.xlu0 %168 }
  0x99   :  { %v176_v52 = vrot.slane %v169_v49, %v161_v40 }
  0x9b   :  { %v178_v53 = vadd.f32 %v176_v52, %v164_v50  ;;  %v179_v54 = vadd.f32 %v176_v52, %v165_v51 }
  0x9d   :  { %180 = vst [vmem:[#allocation5] sm:$0xff] %v178_v53  ;;  %181 = vst [vmem:[#allocation5 + $0x8] sm:$0xff] %v179_v54 }
  0x9e   :  { %249 = shalt.err (!%p246_p12)
}
  0x9f   :  { %s250_s5 = scalar_lea.hbm %s353_s3, 256 }
  0xa0   :  { %p251_p13 = scmp.ne.s32.totalorder %s353_s3, %s250_s5  ;;  %p254_p0 = scmp.lt.u32.totalorder %s250_s5, %s353_s3 }
  0xa2   :  { %p256_p1 = pnand %p254_p0, %p251_p13 }
  0xa4   :  { %259 = shalt.err (!%p256_p1)
}
  0xa5   :  { %193 = dma.vmem_to_hbm [thread:$0]  %s188_s1, 256, %s353_s3, [#allocation4], %s265_s22, %s265_s22, %s266_s23  }
  0xa6   :  { %262 = dma.done.wait [#allocation4], 256  }
  0xa7   :  { %263 = vsyncadd [#allocation4], 4294967040 }
  0xa8   :  { %197 = vsyncpa [#allocation3], 1 }
  0xa9   :  { %198 = vsyncpa [#allocation4], 1 }

</bundles_post_ra>
